<compile_context>
chip_gen: v7x
topology: tpu7x:2x2x1
jax: 0.10.0
libtpu: 0.0.40
codegen_flags: <defaults>
</compile_context>

<pallas_src>
import functools

import jax
import jax.numpy as jnp
from jax.experimental import pallas as pl
from jax.experimental.pallas import tpu as pltpu


# ----------------------------------------------------------------------------- kernel
def _additive_attn_kernel(x_ref, m_ref, w1_ref, b1_ref, w2_ref, b2_ref,
                          o_ref, a_ref, *, low_precision_avg):
    tb, n, d = x_ref.shape            # (TB, N_pad, D)
    h_dim = w1_ref.shape[1]

    x = x_ref[...]                                                # (TB, N, D), native dtype

    # --- fc1 on the MXU: fuse TB batches into one (TB*N, D) @ (D, H) matmul.
    # N_pad is sublane-aligned in the wrapper, so this reshape is layout-free.
    xf = x.reshape(tb * n, d)
    h = jnp.dot(xf, w1_ref[...], preferred_element_type=jnp.float32)
    h = jnp.tanh(h + b1_ref[...].astype(jnp.float32))             # (TB*N, H) f32, tanh on EUP

    # --- fc2 on the VPU/XLU (output dim is 1 -> degenerate on the MXU).
    w2 = w2_ref[...].astype(jnp.float32).reshape(1, 1, h_dim)     # (1, 1, H)
    s = jnp.sum(h.reshape(tb, n, h_dim) * w2, axis=-1)            # (TB, N), N on lanes
    s = s + b2_ref[0].astype(jnp.float32)

    # --- exp -> mask -> normalize over N (lane-dense).
    # NOTE: exp without max-subtraction to match the PyTorch module exactly
    # (including the +1e-8 denominator behavior).
    a = jnp.exp(s) * m_ref[...].astype(jnp.float32)               # (TB, N)
    a = a / (jnp.sum(a, axis=-1, keepdims=True) + 1e-8)

    # --- Weighted average over N: out[t, :] = sum_n a[t, n] * x[t, n, :].
    if low_precision_avg:
        # Product in the (bf16) input dtype (bf16 VALUs on v6e/v7x), f32 accumulate.
        out = jnp.sum(a.astype(x.dtype)[:, :, None] * x, axis=1, dtype=jnp.float32)
    else:
        out = jnp.sum(a[:, :, None] * x.astype(jnp.float32), axis=1)   # (TB, D)

    o_ref[...] = out.astype(o_ref.dtype)                          # (TB, D)   dense store
    a_ref[...] = a.astype(a_ref.dtype)                            # (TB, N)   dense store


# ----------------------------------------------------------------------------- helpers
def _cdiv(a, b):
    return -(-a // b)


def _round_up(v, m):
    return ((v + m - 1) // m) * m


def _device_kind():
    try:
        return jax.devices()[0].device_kind.lower()
    except Exception:
        return ""


def _const_spec(shape):
    """BlockSpec for an operand that is identical for every grid step.

    Single-buffered (it is never re-fetched), saving VMEM -- meaningful against
    v7x's 64 MiB budget, harmless elsewhere. Falls back gracefully if this JAX
    version does not expose pipeline_mode/Buffered.
    """
    index_map = lambda b: (0,) * len(shape)
    buffered = getattr(pl, "Buffered", None)
    if buffered is not None:
        try:
            return pl.BlockSpec(shape, index_map, pipeline_mode=buffered(1))
        except TypeError:
            pass
    return pl.BlockSpec(shape, index_map)


def _pick_batch_tile(B, n_pad, D, itemsize, sub, *, is_v5e, is_v7x):
    """Pick (TB, num_grid_steps).

    Sized by bytes (~2 MiB x block per pipeline buffer -- the kernel is
    HBM-bound, so bigger DMAs amortize per-step overhead), nudged toward the
    MXU M granularity, TB kept a multiple of the sublane count when there is
    more than one grid step (dense sublane-aligned 2-D output/mask blocks),
    and an even grid-step count preferred on v7x only (2 TensorCores).
    """
    target_bytes = 2 << 20                        # ~2 MiB x block per buffer
    row_bytes = max(1, n_pad * max(D, 128) * itemsize)
    tb = max(1, target_bytes // row_bytes)

    m_gran = 128 if is_v5e else 256               # MXU M granularity
    if tb * n_pad > m_gran:
        aligned_rows = (tb * n_pad // m_gran) * m_gran
        if aligned_rows >= n_pad and aligned_rows % n_pad == 0:
            tb = aligned_rows // n_pad

    if tb >= B:
        tb, nblocks = B, 1
    else:
        tb = max(sub, (tb // sub) * sub)
        if tb >= B:
            tb, nblocks = B, 1
        else:
            nblocks = _cdiv(B, tb)

    if is_v7x:
        # Only v7x has 2 TensorCores -> dimension_semantics=("parallel",)
        # sharding wants an even number of grid steps there.
        if nblocks == 1 and tb >= 2 * sub:
            tb = _round_up(_cdiv(tb, 2), sub)     # split the work across the 2 TCs
            nblocks = _cdiv(B, tb)
        if nblocks > 1 and nblocks % 2 == 1:
            nblocks += 1                          # extra block is all padding (mask = 0)

    return int(tb), int(nblocks)


# ----------------------------------------------------------------------------- wrapper
def additive_attention(x, w1, b1, w2, b2, m=None, return_weights=False):
    """x: (B, N, D); w1: (D, H); b1: (H,); w2: (H, 1); b2: (1,); m: (B, N, 1) or None."""
    B, N, D = x.shape
    H = w1.shape[1]
    dtype = x.dtype
    itemsize = jnp.dtype(dtype).itemsize
    sub = max(8, 32 // itemsize)                  # sublane multiple for this dtype

    kind = _device_kind()
    is_v5e = ("v5 lite" in kind) or ("v5e" in kind) or ("v5litepod" in kind)
    is_v7x = ("v7" in kind) or ("7x" in kind)

    # --- Pad N to the sublane multiple so in-kernel reshapes stay tile-aligned.
    n_pad = _round_up(N, sub)
    if m is None:
        m2 = jnp.ones((B, N), dtype=dtype)
    else:
        m2 = m.reshape(B, N).astype(dtype)        # (B, N, 1) -> dense (B, N)
    x_p = x
    if n_pad != N:
        x_p = jnp.pad(x_p, ((0, 0), (0, n_pad - N), (0, 0)))
        m2 = jnp.pad(m2, ((0, 0), (0, n_pad - N)))       # padded rows: mask = 0

    # --- Batch tiling (byte-sized, generation-aware) + batch padding.
    tb, nblocks = _pick_batch_tile(B, n_pad, D, itemsize, sub,
                                   is_v5e=is_v5e, is_v7x=is_v7x)
    b_pad = tb * nblocks
    if b_pad != B:
        x_p = jnp.pad(x_p, ((0, b_pad - B), (0, 0), (0, 0)))
        m2 = jnp.pad(m2, ((0, b_pad - B), (0, 0)))        # padded batches: mask = 0

    b1_2d = b1.reshape(1, H)
    w2_row = w2.reshape(1, H)                     # (H, 1) -> (1, H), same element order
    b2_sc = b2.reshape(1).astype(jnp.float32)     # scalar through SMEM

    # --- VMEM budget from padded tile shapes; tighter cap on v7x (64 MiB phys).
    lane = 128
    x_blk = tb * n_pad * _round_up(D, lane) * itemsize
    m_blk = _round_up(tb, sub) * _round_up(n_pad, lane) * itemsize
    o_blk = _round_up(tb, sub) * _round_up(D, lane) * itemsize
    a_blk = _round_up(tb, sub) * _round_up(n_pad, lane) * itemsize
    w_bytes = (_round_up(D, sub) + 2 * sub) * _round_up(H, lane) * itemsize
    interm = tb * n_pad * (_round_up(H, lane) + _round_up(D, lane) + lane) * 4
    need = 2 * (x_blk + m_blk + o_blk + a_blk) + w_bytes + interm
    cap = (40 << 20) if is_v7x else (64 << 20)
    vmem_limit = int(min(max(2 * need, 32 << 20), cap))

    # Keep the weighted-average product in the input dtype only where the VPU
    # has native bf16 (v6e/v7x); v5e / f32 inputs use the f32 path.
    low_precision_avg = (itemsize < 4) and (not is_v5e)

    kernel = functools.partial(_additive_attn_kernel,
                               low_precision_avg=low_precision_avg)

    out2, a2 = pl.pallas_call(
        kernel,
        out_shape=(
            jax.ShapeDtypeStruct((b_pad, D), dtype),       # weighted average, 2-D slab
            jax.ShapeDtypeStruct((b_pad, n_pad), dtype),   # attention weights, 2-D slab
        ),
        grid_spec=pltpu.PrefetchScalarGridSpec(
            num_scalar_prefetch=0,
            grid=(nblocks,),
            in_specs=[
                pl.BlockSpec((tb, n_pad, D), lambda b: (b, 0, 0)),    # x
                pl.BlockSpec((tb, n_pad), lambda b: (b, 0)),          # mask (dense 2-D)
                _const_spec((D, H)),                                  # w1 (single-buffered)
                _const_spec((1, H)),                                  # b1
                _const_spec((1, H)),                                  # w2 (row vector)
                pl.BlockSpec(memory_space=pltpu.MemorySpace.SMEM),    # b2 scalar
            ],
            out_specs=[
                pl.BlockSpec((tb, D), lambda b: (b, 0)),              # dense (TB, D) store
                pl.BlockSpec((tb, n_pad), lambda b: (b, 0)),          # dense (TB, N) store
            ],
        ),
        compiler_params=pltpu.CompilerParams(
            dimension_semantics=("parallel",),
            vmem_limit_bytes=vmem_limit,
        ),
    )(x_p, m2, w1, b1_2d, w2_row, b2_sc)

    out = out2[:B].reshape(B, 1, D)                        # (B, 1, D)
    if return_weights:
        weights = a2[:B, :N].reshape(B, N, 1)              # (B, N, 1)
        return out, weights
    return out


# ----------------------------------------------------------------------------- reference
def _reference(x, w1, b1, w2, b2, m=None):
    # Plain-JAX reference mirroring the PyTorch forward exactly.
    a = jnp.einsum('bnh,ho->bno',
                   jnp.tanh(jnp.einsum('bnd,dh->bnh', x, w1) + b1), w2) + b2
    a = jnp.exp(a)
    if m is not None:
        a = a * m
    a = a / (jnp.sum(a, axis=1, keepdims=True) + 1e-8)
    return jnp.einsum('bon,bnd->bod', jnp.swapaxes(a, -1, -2), x), a


# ----------------------------------------------------------------------------- test
if __name__ == "__main__":
    key = jax.random.PRNGKey(0)

    def make_case(key, B, N, D, H, with_mask):
        kx, km, k1, k2, k3, k4 = jax.random.split(key, 6)
        x = jax.random.normal(kx, (B, N, D), dtype=jnp.float32)
        m = ((jax.random.uniform(km, (B, N, 1)) > 0.3).astype(jnp.float32)
             if with_mask else None)
        # nn.Linear-style init: U(-1/sqrt(fan_in), 1/sqrt(fan_in))
        lim1 = 1.0 / (D ** 0.5)
        w1 = jax.random.uniform(k1, (D, H), minval=-lim1, maxval=lim1, dtype=jnp.float32)
        b1 = jax.random.uniform(k2, (H,), minval=-lim1, maxval=lim1, dtype=jnp.float32)
        lim2 = 1.0 / (H ** 0.5)
        w2 = jax.random.uniform(k3, (H, 1), minval=-lim2, maxval=lim2, dtype=jnp.float32)
        b2 = jax.random.uniform(k4, (1,), minval=-lim2, maxval=lim2, dtype=jnp.float32)
        return x, m, w1, b1, w2, b2

    k_a, k_b = jax.random.split(key)

    # Case 1: aligned shapes with a mask.
    x, m, w1, b1, w2, b2 = make_case(k_a, B=2, N=8, D=32, H=32, with_mask=True)
    out, weights = additive_attention(x, w1, b1, w2, b2, m=m, return_weights=True)
    out = jax.block_until_ready(out)
    weights = jax.block_until_ready(weights)
    ref_out, ref_w = _reference(x, w1, b1, w2, b2, m=m)
    assert out.shape == (2, 1, 32)
    assert weights.shape == (2, 8, 1)
    assert jnp.allclose(out, ref_out, atol=2e-5, rtol=2e-5), "case1 output mismatch"
    assert jnp.allclose(weights, ref_w, atol=2e-5, rtol=2e-5), "case1 weights mismatch"

    # Case 2: ragged N (exercises N-padding with zero-mask rows), no mask.
    x, m, w1, b1, w2, b2 = make_case(k_b, B=3, N=5, D=64, H=48, with_mask=False)
    out, weights = additive_attention(x, w1, b1, w2, b2, m=None, return_weights=True)
    out = jax.block_until_ready(out)
    weights = jax.block_until_ready(weights)
    ref_out, ref_w = _reference(x, w1, b1, w2, b2, m=None)
    assert out.shape == (3, 1, 64)
    assert weights.shape == (3, 5, 1)
    assert jnp.allclose(out, ref_out, atol=2e-5, rtol=2e-5), "case2 output mismatch"
    assert jnp.allclose(weights, ref_w, atol=2e-5, rtol=2e-5), "case2 weights mismatch"

    print("KERNEL_OK")
</pallas_src>

<mosaic_0001>
module attributes {stable_mosaic.version = 11 : i64} {
  func.func @_additive_attn_kernel(%arg0: i32, %arg1: memref<2x8x32xf32, #tpu.memory_space<vmem>>, %arg2: memref<2x8xf32, #tpu.memory_space<vmem>>, %arg3: memref<32x32xf32, #tpu.memory_space<vmem>>, %arg4: memref<1x32xf32, #tpu.memory_space<vmem>>, %arg5: memref<1x32xf32, #tpu.memory_space<vmem>>, %arg6: memref<1xf32, #tpu.memory_space<smem>>, %arg7: memref<2x32xf32, #tpu.memory_space<vmem>>, %arg8: memref<2x8xf32, #tpu.memory_space<vmem>>) attributes {dimension_semantics = [#tpu.dimension_semantics<parallel>], iteration_bounds = array<i64: 1>, scalar_prefetch = 0 : i64, scratch_operands = 0 : i64, tpu.core_type = #tpu.core_type<tc>, window_params = [{transform_indices = @transform_0, window_bounds = array<i64: 2, 8, 32>}, {transform_indices = @transform_1, window_bounds = array<i64: 2, 8>}, {pipeline_mode = #tpu.pipeline_mode<synchronous>, transform_indices = @transform_2, window_bounds = array<i64: 32, 32>}, {pipeline_mode = #tpu.pipeline_mode<synchronous>, transform_indices = @transform_3, window_bounds = array<i64: 1, 32>}, {pipeline_mode = #tpu.pipeline_mode<synchronous>, transform_indices = @transform_4, window_bounds = array<i64: 1, 32>}, {transform_indices = @transform_5, window_bounds = array<i64: 1>}, {transform_indices = @transform_6, window_bounds = array<i64: 2, 32>}, {transform_indices = @transform_7, window_bounds = array<i64: 2, 8>}]} {
    %c0 = arith.constant 0 : index
    %c0_0 = arith.constant 0 : index
    %c0_1 = arith.constant 0 : index
    %0 = vector.load %arg1[%c0, %c0_0, %c0_1] : memref<2x8x32xf32, #tpu.memory_space<vmem>>, vector<2x8x32xf32>
    %1 = vector.shape_cast %0 : vector<2x8x32xf32> to vector<16x32xf32>
    %c0_2 = arith.constant 0 : index
    %c0_3 = arith.constant 0 : index
    %2 = vector.load %arg3[%c0_2, %c0_3] : memref<32x32xf32, #tpu.memory_space<vmem>>, vector<32x32xf32>
    %cst = arith.constant dense<0.000000e+00> : vector<16x32xf32>
    %3 = tpu.matmul %1, %2, %cst {dimension_numbers = #tpu.dot_dimension_numbers<[1], [0], [0], [1], [0, 0, 1, 1], [], []>} : vector<16x32xf32>, vector<32x32xf32>, vector<16x32xf32> -> vector<16x32xf32>
    %c0_4 = arith.constant 0 : index
    %c0_5 = arith.constant 0 : index
    %4 = vector.load %arg4[%c0_4, %c0_5] : memref<1x32xf32, #tpu.memory_space<vmem>>, vector<1x32xf32>
    %5 = vector.broadcast %4 : vector<1x32xf32> to vector<16x32xf32>
    %6 = arith.addf %3, %5 : vector<16x32xf32>
    %7 = math.tanh %6 : vector<16x32xf32>
    %c0_6 = arith.constant 0 : index
    %c0_7 = arith.constant 0 : index
    %8 = vector.load %arg5[%c0_6, %c0_7] : memref<1x32xf32, #tpu.memory_space<vmem>>, vector<1x32xf32>
    %9 = vector.shape_cast %8 : vector<1x32xf32> to vector<1x1x32xf32>
    %10 = vector.shape_cast %7 : vector<16x32xf32> to vector<2x8x32xf32>
    %11 = vector.broadcast %9 : vector<1x1x32xf32> to vector<2x8x32xf32>
    %12 = arith.mulf %10, %11 : vector<2x8x32xf32>
    %cst_8 = arith.constant dense<0.000000e+00> : vector<2x8xf32>
    %13 = vector.multi_reduction <add>, %12, %cst_8 [2] : vector<2x8x32xf32> to vector<2x8xf32>
    %c0_9 = arith.constant 0 : index
    %14 = memref.load %arg6[%c0_9] : memref<1xf32, #tpu.memory_space<smem>>
    %15 = vector.broadcast %14 : f32 to vector<2x8xf32>
    %16 = arith.addf %13, %15 : vector<2x8xf32>
    %17 = math.exp %16 : vector<2x8xf32>
    %c0_10 = arith.constant 0 : index
    %c0_11 = arith.constant 0 : index
    %18 = vector.load %arg2[%c0_10, %c0_11] : memref<2x8xf32, #tpu.memory_space<vmem>>, vector<2x8xf32>
    %19 = arith.mulf %17, %18 : vector<2x8xf32>
    %cst_12 = arith.constant dense<0.000000e+00> : vector<2xf32>
    %20 = vector.multi_reduction <add>, %19, %cst_12 [1] : vector<2x8xf32> to vector<2xf32>
    %21 = vector.shape_cast %20 : vector<2xf32> to vector<2x1xf32>
    %cst_13 = arith.constant 9.99999993E-9 : f32
    %22 = vector.broadcast %cst_13 : f32 to vector<2x1xf32>
    %23 = arith.addf %21, %22 : vector<2x1xf32>
    %24 = vector.broadcast %23 : vector<2x1xf32> to vector<2x8xf32>
    %25 = arith.divf %19, %24 : vector<2x8xf32>
    %26 = vector.shape_cast %25 : vector<2x8xf32> to vector<2x8x1xf32>
    %27 = vector.broadcast %26 : vector<2x8x1xf32> to vector<2x8x32xf32>
    %28 = arith.mulf %27, %0 : vector<2x8x32xf32>
    %cst_14 = arith.constant dense<0.000000e+00> : vector<2x32xf32>
    %29 = vector.multi_reduction <add>, %28, %cst_14 [1] : vector<2x8x32xf32> to vector<2x32xf32>
    %c0_15 = arith.constant 0 : index
    %c0_16 = arith.constant 0 : index
    %30 = vector.load %arg7[%c0_15, %c0_16] : memref<2x32xf32, #tpu.memory_space<vmem>>, vector<2x32xf32>
    tpu.vector_store %arg7[%c0_15, %c0_16], %29 {strides = array<i32>} : memref<2x32xf32, #tpu.memory_space<vmem>>, vector<2x32xf32>,
    %c0_17 = arith.constant 0 : index
    %c0_18 = arith.constant 0 : index
    %31 = vector.load %arg8[%c0_17, %c0_18] : memref<2x8xf32, #tpu.memory_space<vmem>>, vector<2x8xf32>
    tpu.vector_store %arg8[%c0_17, %c0_18], %25 {strides = array<i32>} : memref<2x8xf32, #tpu.memory_space<vmem>>, vector<2x8xf32>,
    return
  }
  func.func @transform_0(%arg0: i32) -> (i32, i32, i32) {
    %c0_i32 = arith.constant 0 : i32
    %c0_i32_0 = arith.constant 0 : i32
    %c0_i32_1 = arith.constant 0 : i32
    return %arg0, %c0_i32, %c0_i32_0 : i32, i32, i32
  }
  func.func @transform_1(%arg0: i32) -> (i32, i32) {
    %c0_i32 = arith.constant 0 : i32
    %c0_i32_0 = arith.constant 0 : i32
    return %arg0, %c0_i32 : i32, i32
  }
  func.func @transform_2(%arg0: i32) -> (i32, i32) {
    %c0_i32 = arith.constant 0 : i32
    %c0_i32_0 = arith.constant 0 : i32
    %c0_i32_1 = arith.constant 0 : i32
    return %c0_i32, %c0_i32_0 : i32, i32
  }
  func.func @transform_3(%arg0: i32) -> (i32, i32) {
    %c0_i32 = arith.constant 0 : i32
    %c0_i32_0 = arith.constant 0 : i32
    %c0_i32_1 = arith.constant 0 : i32
    return %c0_i32, %c0_i32_0 : i32, i32
  }
  func.func @transform_4(%arg0: i32) -> (i32, i32) {
    %c0_i32 = arith.constant 0 : i32
    %c0_i32_0 = arith.constant 0 : i32
    %c0_i32_1 = arith.constant 0 : i32
    return %c0_i32, %c0_i32_0 : i32, i32
  }
  func.func @transform_5(%arg0: i32) -> i32 {
    %c0_i32 = arith.constant 0 : i32
    %c0_i32_0 = arith.constant 0 : i32
    return %c0_i32 : i32
  }
  func.func @transform_6(%arg0: i32) -> (i32, i32) {
    %c0_i32 = arith.constant 0 : i32
    %c0_i32_0 = arith.constant 0 : i32
    return %arg0, %c0_i32 : i32, i32
  }
  func.func @transform_7(%arg0: i32) -> (i32, i32) {
    %c0_i32 = arith.constant 0 : i32
    %c0_i32_0 = arith.constant 0 : i32
    return %arg0, %c0_i32 : i32, i32
  }
}

</mosaic_0001>

<bundles_post_ra>
// kernel: tpu_custom_call.1
= control target key start
LH: loop header
LB: loop body
LE: loop exit
PB: predicated region body
PF: predicated region fallthrough
CT: control target
= control target key end

     0   :  { %14 = vsyncpa [#allocation4], 0  ;;  %s582_s0 = inlined_call_operand.hbm [shape: f32[2,8,32], index: 0, kind: input, shape index: {}]   ;;  %s583_s1 = inlined_call_operand.vmem [shape: f32[2,8], index: 1, kind: input, shape index: {}]   ;;  %s584_s2 = inlined_call_operand.hbm [shape: f32[32,32], index: 2, kind: input, shape index: {}]   ;;  %s585_s3 = inlined_call_operand.vmem [shape: f32[1,32], index: 3, kind: input, shape index: {}]   ;;  %s586_s4 = inlined_call_operand.vmem [shape: f32[1,32], index: 4, kind: input, shape index: {}]   ;;  %s587_s5 = inlined_call_operand.<no memory space> [shape: f32[1], index: 5, kind: input, shape index: {}]   ;;  %s588_s6 = inlined_call_operand.hbm [shape: f32[2,32], index: 6, kind: output, shape index: {0}]   ;;  %s589_s7 = inlined_call_operand.hbm [shape: f32[2,8], index: 7, kind: output, shape index: {1}]  }
   0x1   :  { %15 = vsyncpa [#allocation7], 0 }
   0x2   :  { %16 = vsyncpa [#allocation5], 0 }
   0x3   :  { %17 = vsyncpa [#allocation10], 0  ;;  %s456_s24 = smov [#allocation3]   ;;  %s360_s28 = scalar_lea.hbm %s582_s0, 256 }
   0x4   :  { %s23_s25 = sshll.u32 %s456_s24, 4  ;;  %p361_p0 = scmp.ne.s32.totalorder %s582_s0, %s360_s28  ;;  %s24_s25 = int_to_ptr.vmem [resolvable:$true] %s23_s25 }
   0x5   :  { %p364_p1 = scmp.lt.u32.totalorder %s360_s28, %s582_s0 }
   0x7   :  { %p366_p2 = pnand %p364_p1, %p361_p0 }
   0x9   :  { %369 = shalt.err (!%p366_p2)
}
   0xa   :  { %s370_s10 = scalar_lea.vmem %s24_s25, 256  ;;  %p375_p4 = scmp.lt.s32.totalorder %s24_s25, %s24_s25 }
   0xb   :  { %p371_p3 = scmp.ne.s32.totalorder %s24_s25, %s370_s10  ;;  %p376_p5 = scmp.lt.s32.totalorder %s370_s10, %s370_s10 }
   0xd   :  { %p377_p6 = por %p376_p5, %p375_p4 }
   0xf   :  { %p378_p7 = pnand %p377_p6, %p371_p3 }
  0x11   :  { %381 = shalt.err (!%p378_p7)
}
  0x12   :  { %s457_s11 = smov 128   ;;  %s458_s12 = smov 8  }
  0x13   :  { %29 = dma.hbm_to_vmem [thread:$0]  %s582_s0, 256, %s24_s25, [#allocation4], %s457_s11, %s457_s11, %s458_s12  }
  0x14   :  { %s459_s15 = smov [#allocation6]   ;;  %s382_s19 = scalar_lea.hbm %s584_s2, 512 }
  0x15   :  { %s37_s16 = sshll.u32 %s459_s15, 4  ;;  %p383_p8 = scmp.ne.s32.totalorder %s584_s2, %s382_s19  ;;  %s38_s16 = int_to_ptr.vmem [resolvable:$true] %s37_s16 }
  0x16   :  { %p386_p9 = scmp.lt.u32.totalorder %s382_s19, %s584_s2 }
  0x18   :  { %p388_p10 = pnand %p386_p9, %p383_p8 }
  0x1a   :  { %391 = shalt.err (!%p388_p10)
}
  0x1b   :  { %s392_s24 = scalar_lea.vmem %s38_s16, 512  ;;  %p397_p12 = scmp.lt.s32.totalorder %s38_s16, %s38_s16 }
  0x1c   :  { %p393_p11 = scmp.ne.s32.totalorder %s38_s16, %s392_s24  ;;  %p398_p13 = scmp.lt.s32.totalorder %s392_s24, %s392_s24 }
  0x1e   :  { %p399_p0 = por %p398_p13, %p397_p12 }
  0x20   :  { %p400_p1 = pnand %p399_p0, %p393_p11 }
  0x22   :  { %403 = shalt.err (!%p400_p1)
}
  0x23   :  { %43 = dma.hbm_to_vmem [thread:$0]  %s584_s2, 512, %s38_s16, [#allocation7], %s457_s11, %s457_s11, %s458_s12  }
  0x24   :  { %448 = dma.done.wait [#allocation4], 256  }
  0x25   :  { %449 = vsyncadd [#allocation4], 4294967040 }
  0x26   :  { %450 = dma.done.wait [#allocation7], 512  }
  0x27   :  { %451 = vsyncadd [#allocation7], 4294966784  ;;  %vm69_vm0 = vcmask 261120   ;;  %v58_v0 = vld [vmem:[#allocation6] sm:$0xff]  ;;  %v59_v1 = vld [vmem:[#allocation6 + $0x8] sm:$0xff]  ;;  %v178_v8 = vlaneseq  ;;  %v460_v27 = vmov 0   ;;  %v169_v28 = vstv %s587_s5 }
  0x28   :  { %v60_v2 = vld [vmem:[#allocation6 + $0x10] sm:$0xff]  ;;  %v331_v3 = vpack.c.bf16 %v59_v1, %v58_v0  ;;  %v61_v4 = vld [vmem:[#allocation6 + $0x18] sm:$0xff]  ;;  %346 = vset.pattern.permute.xlu0 %v460_v27  ;;  %347 = vset.pattern.permute.xlu1 %v460_v27  ;;  %vm214_vm1 = vcmask 1041409   ;;  %vm217_vm2 = vcmask 58368  }
  0x29   :  { %v527_v5 = vld [vmem:[#allocation3] sm:$0xff]  ;;  %v335_v6 = vpack.c.bf16 %v61_v4, %v60_v2  ;;  %v531_v7 = vld [vmem:[#allocation3 + $0x8] sm:$0xff]  ;;  %v179_v9 = vshrl.u32 %v178_v8, 7  ;;  %v205_v41 = vand.u32 127, %v178_v8 }
  0x2a   :  { %328 = vmatprep.mubr.msk.f32.mxu0 %vm69_vm0, %v527_v5  ;;  %332 = vmatprep.subr.bf16.mxu0 %v331_v3  ;;  %v176_v10 = vld [vmem:[%s583_s1] sm:$0x3] }
  0x2b   :  { %334 = vmatpush3.bf16.msra.mxu0 %v331_v3  ;;  %v180_v11 = vsub.s32 0, %v179_v9  ;;  %v187_v12 = vsub.s32 1, %v179_v9  ;;  %v310_v15 = vld [vmem:[%s585_s3] ss:$0 sm:$0xff]  ;;  %v208_v42 = vsub.s32 %v205_v41, %v179_v9 }
  0x2c   :  { %336 = vmatprep.subr.bf16.mxu0 %v335_v6  ;;  %v313_v20 = vld [vmem:[%s586_s4] ss:$0 sm:$0xff]  ;;  %s461_s4 = smov [#allocation9]  }
  0x2d   :  { %v181_v13 = vrot.slane %v176_v10, %v180_v11  ;;  %v188_v14 = vrot.slane %v176_v10, %v187_v12  ;;  %s296_s5 = sshll.u32 %s461_s4, 4  ;;  %s297_s5 = int_to_ptr.vmem [resolvable:$true] %s296_s5 }
  0x2e   :  { %s404_s8 = scalar_lea.vmem %s297_s5, 32  ;;  %p409_p3 = scmp.lt.s32.totalorder %s297_s5, %s297_s5 }
  0x2f   :  { %338 = vmatpush3.bf16.msra.mxu0 %v335_v6  ;;  %183 = vbcast.lane.b32.xlu1 %v181_v13, 256  ;;  %p405_p2 = scmp.ne.s32.totalorder %s297_s5, %s404_s8  ;;  %p410_p4 = scmp.lt.s32.totalorder %s404_s8, %s404_s8 }
  0x31   :  { %p411_p5 = por %p410_p4, %p409_p3 }
  0x32   :  { %329 = vmatmul.mubr.msk.f32.vlgmr.msra.gmra.mrb[0].mxu0 %vm69_vm0, %v531_v7 }
  0x33   :  { %190 = vbcast.lane.b32.xlu1 %v188_v14, 256  ;;  %p412_p6 = pnand %p411_p5, %p405_p2 }
  0xa1   :  { %v184_v35 = vpop.permute.xlu1 %183 }
  0xa5   :  { %v191_v38 = vpop.permute.xlu1 %190 }
 0x105   :  { %v330_v16 = vpop.f32.mrb[0].mxu0 }
 0x106   :  { %v148_v17 = vadd.f32 %v330_v16, %v310_v15  ;;  %v142_v18 = vpop.f32.mrb[1].mxu0 }
 0x107   :  { %v143_v19 = vadd.f32 %v310_v15, %v142_v18 }
 0x108   :  { %348 = vtanh.f32 %v148_v17 }
 0x109   :  { %350 = vtanh.f32 %v143_v19 }
 0x112   :  { %v349_v21 = vpop.eup %348 }
 0x113   :  { %v351_v22 = vpop.eup %350  ;;  %v161_v25 = vmul.f32 %v349_v21, %v313_v20 }
 0x114   :  { %v160_v23 = vmul.f32 %v351_v22, %v313_v20 }
 0x115   :  { %v165_v26 = vsel %vm69_vm0, %v161_v25, 0.0 }
 0x116   :  { %v162_v24 = vsel %vm69_vm0, %v160_v23, 0.0 }
 0x117   :  { %163 = vadd.xlane.f32.xlu0 %v162_v24 }
 0x11b   :  { %166 = vadd.xlane.f32.xlu0 %v165_v26 }
 0x1a4   :  { %v164_v29 = vpop.xlane.xlu0 %163 }
 0x1a5   :  { %v170_v30 = vadd.f32 %v169_v28, %v164_v29 }
 0x1a7   :  { %v172_v31 = vmul.f32 1.442695, %v170_v30 }
 0x1a8   :  { %v167_v32 = vpop.xlane.xlu0 %166 }
 0x1a9   :  { %352 = vpow2.f32 %v172_v31  ;;  %v171_v33 = vadd.f32 %v169_v28, %v167_v32 }
 0x1ab   :  { %v174_v34 = vmul.f32 1.442695, %v171_v33 }
 0x1ad   :  { %354 = vpow2.f32 %v174_v34 }
 0x1b3   :  { %v353_v36 = vpop.eup %352 }
 0x1b4   :  { %v194_v37 = vmul.f32 %v353_v36, %v184_v35 }
 0x1b6   :  { %199 = vperm.xlu0 %346, %v194_v37  }
 0x1b7   :  { %v355_v39 = vpop.eup %354 }
 0x1b8   :  { %v195_v40 = vmul.f32 %v355_v39, %v191_v38 }
 0x1ba   :  { %202 = vperm.xlu1 %347, %v195_v40  }
 0x235   :  { %v200_v43 = vpop.permute.xlu0 %199 }
 0x236   :  { %v209_v45 = vrot.slane %v200_v43, %v208_v42 }
 0x239   :  { %v203_v44 = vpop.permute.xlu1 %202 }
 0x23a   :  { %v213_v46 = vrot.slane %v203_v44, %v208_v42 }
 0x23c   :  { %v215_v47 = vsel %vm214_vm1, %v213_v46, %v209_v45 }
 0x23d   :  { %v218_v48 = vsel %vm217_vm2, %v215_v47, 0.0 }
 0x23e   :  { %219 = vadd.xlane.f32.xlu1 %v218_v48 }
 0x2cb   :  { %v220_v49 = vpop.xlane.xlu1 %219 }
 0x2cc   :  { %v221_v50 = vadd.f32 1e-08, %v220_v49 }
 0x2ce   :  { %v226_v51 = vrot.slane %v221_v50, %v180_v11  ;;  %v230_v52 = vrot.slane %v221_v50, %v187_v12 }
 0x2d0   :  { %356 = vrcp.f32 %v226_v51 }
 0x2d1   :  { %358 = vrcp.f32 %v230_v52 }
 0x2da   :  { %v357_v53 = vpop.eup %356 }
 0x2db   :  { %v359_v54 = vpop.eup %358  ;;  %v234_v55 = vmul.f32 %v357_v53, %v194_v37 }
 0x2dc   :  { %v236_v56 = vmul.f32 %v359_v54, %v195_v40 }
 0x2dd   :  { %239 = vperm.xlu1 %347, %v234_v55  }
 0x2de   :  { %244 = vperm.xlu0 %346, %v236_v56  }
 0x35c   :  { %v240_v57 = vpop.permute.xlu1 %239 }
 0x35d   :  { %v245_v58 = vpop.permute.xlu0 %244  ;;  %v247_v59 = vmul.f32 %v240_v57, %v527_v5  ;;  %v272_v60 = vrot.slane %v240_v57, %v208_v42 }
 0x35e   :  { %v248_v61 = vmul.f32 %v245_v58, %v531_v7  ;;  %v276_v62 = vrot.slane %v245_v58, %v208_v42 }
 0x35f   :  { %v249_v63 = vsel %vm69_vm0, %v247_v59, 0.0 }
 0x360   :  { %v256_v0 = vsel %vm69_vm0, %v248_v61, 0.0  ;;  %v250_v1 = vrot.slane %v249_v63, 4  ;;  %v277_v2 = vsel %vm214_vm1, %v276_v62, %v272_v60 }
 0x361   :  { %v257_v3 = vrot.slane %v256_v0, 4  ;;  %279 = vst.msk [vmem:[#allocation9] sm:$0x3] %vm217_vm2, %v277_v2 }
 0x362   :  { %v251_v4 = vadd.f32 %v250_v1, %v249_v63 }
 0x363   :  { %415 = shalt.err (!%p412_p6)
}
 0x364   :  { %s416_s11 = scalar_lea.hbm %s589_s7, 32 }
 0x365   :  { %p417_p7 = scmp.ne.s32.totalorder %s589_s7, %s416_s11  ;;  %p420_p8 = scmp.lt.u32.totalorder %s416_s11, %s589_s7 }
 0x367   :  { %p422_p9 = pnand %p420_p8, %p417_p7 }
 0x369   :  { %425 = shalt.err (!%p422_p9)
}
 0x36a   :  { %299 = dma.vmem_to_hbm [thread:$0]  %s297_s5, 32, %s589_s7, [#allocation10]   ;;  %v258_v5 = vadd.f32 %v257_v3, %v256_v0  ;;  %v252_v6 = vrot.slane %v251_v4, 2  ;;  %vm267_vm3 = vcmask 254976  }
 0x36b   :  { %s462_s18 = smov [#allocation8]  }
 0x36c   :  { %v259_v7 = vrot.slane %v258_v5, 2  ;;  %v253_v8 = vadd.f32 %v252_v6, %v251_v4  ;;  %s286_s19 = sshll.u32 %s462_s18, 4  ;;  %s287_s19 = int_to_ptr.vmem [resolvable:$true] %s286_s19 }
 0x36d   :  { %s426_s20 = scalar_lea.vmem %s287_s19, 32  ;;  %p431_p11 = scmp.lt.s32.totalorder %s287_s19, %s287_s19 }
 0x36e   :  { %v260_v9 = vadd.f32 %v259_v7, %v258_v5  ;;  %v254_v10 = vrot.slane %v253_v8, 1  ;;  %p427_p10 = scmp.ne.s32.totalorder %s287_s19, %s426_s20  ;;  %p432_p12 = scmp.lt.s32.totalorder %s426_s20, %s426_s20 }
 0x370   :  { %v261_v11 = vrot.slane %v260_v9, 1  ;;  %v255_v12 = vadd.f32 %v254_v10, %v253_v8  ;;  %p433_p13 = por %p432_p12, %p431_p11 }
 0x372   :  { %v262_v13 = vadd.f32 %v261_v11, %v260_v9  ;;  %p434_p0 = pnand %p433_p13, %p427_p10 }
 0x374   :  { %v265_v14 = vsel %vm214_vm1, %v262_v13, %v255_v12 }
 0x375   :  { %268 = vst.msk [vmem:[#allocation8] sm:$0x3] %vm267_vm3, %v265_v14 }
 0x376   :  { %437 = shalt.err (!%p434_p0)
}
 0x377   :  { %s438_s22 = scalar_lea.hbm %s588_s6, 32 }
 0x378   :  { %p439_p1 = scmp.ne.s32.totalorder %s588_s6, %s438_s22  ;;  %p442_p2 = scmp.lt.u32.totalorder %s438_s22, %s588_s6 }
 0x37a   :  { %p444_p3 = pnand %p442_p2, %p439_p1 }
 0x37c   :  { %447 = shalt.err (!%p444_p3)
}
 0x37d   :  { %289 = dma.vmem_to_hbm [thread:$0]  %s287_s19, 32, %s588_s6, [#allocation5]  }
 0x37e   :  { %452 = dma.done.wait [#allocation5], 32  }
 0x37f   :  { %453 = vsyncadd [#allocation5], 4294967264 }
 0x380   :  { %454 = dma.done.wait [#allocation10], 32  }
 0x381   :  { %455 = vsyncadd [#allocation10], 4294967264 }
 0x382   :  { %306 = vsyncpa [#allocation4], 1 }
 0x383   :  { %307 = vsyncpa [#allocation7], 1 }
 0x384   :  { %308 = vsyncpa [#allocation5], 1 }
 0x385   :  { %309 = vsyncpa [#allocation10], 1 }

</bundles_post_ra>
